<compile_context>
chip_gen: v5e
topology: v5e:2x2
jax: 0.10.0
libtpu: 0.0.40
codegen_flags: <defaults>
</compile_context>

<pallas_src>
import jax
import jax.numpy as jnp
from jax.experimental import pallas as pl
from jax.experimental.pallas import tpu as pltpu


def mlp_kernel(x_ref, w1_ref, b1_ref, w2_ref, b2_ref, w3_ref, b3_ref, o_ref):
    x = x_ref[...]
    if x.dtype != jnp.bfloat16:          # trace-time branch; no-op for bf16 inputs
        x = x.astype(jnp.bfloat16)
    # fc1 + ReLU
    h1 = jnp.dot(x, w1_ref[...], preferred_element_type=jnp.float32) + b1_ref[...]
    h1 = jnp.maximum(h1, 0.0).astype(jnp.bfloat16)
    # fc2 + ReLU
    h2 = jnp.dot(h1, w2_ref[...], preferred_element_type=jnp.float32) + b2_ref[...]
    h2 = jnp.maximum(h2, 0.0).astype(jnp.bfloat16)
    # fc3 (no activation)
    out = jnp.dot(h2, w3_ref[...], preferred_element_type=jnp.float32) + b3_ref[...]
    o_ref[...] = out.astype(o_ref.dtype)


def _round_up(n, m):
    return ((n + m - 1) // m) * m


def _choose_tile_b(B, cap=2048):
    """Pick a batch tile: multiple of 8, <= cap, and grid >= 2 when the batch allows
    (engages both v7x TensorCores and DMA/compute overlap)."""
    bp8 = _round_up(B, 8)
    if bp8 <= cap:
        if bp8 >= 16 and bp8 % 16 == 0:
            return bp8 // 2              # grid = 2
        return bp8                       # tiny batch: single tile
    # Large batch: prefer an exact divisor of the 8-padded batch in [cap/2, cap].
    for t in range(cap, cap // 2 - 1, -8):
        if bp8 % t == 0:
            return t
    return cap                           # fall back: pad batch up to a cap multiple


def _vmem_limit_bytes(tile_b, in_dim, hidden, out_dim, x_itemsize):
    x_bytes = tile_b * in_dim * x_itemsize * 2          # input block, double buffered
    o_bytes = tile_b * out_dim * 4 * 2                   # f32 output block, double buffered
    w_bytes = (in_dim * hidden + hidden * hidden + hidden * out_dim) * 2 * 2  # bf16 weights
    b_bytes = (2 * hidden + out_dim) * 4 * 2             # f32 biases
    inter = tile_b * hidden * (4 + 2) * 2                # h1/h2 f32 + bf16 copies
    need = x_bytes + o_bytes + w_bytes + b_bytes + inter
    # 2x headroom, >=16 MiB for Mosaic internal scratch, <=48 MiB (under v7x's 64 MiB).
    return int(min(max(2 * need, 16 * 1024 * 1024), 48 * 1024 * 1024))


def prepare_params(params):
    """One-time weight prep (bf16 casts). Call once, reuse across forward calls."""
    return dict(
        w1=params["w1"].astype(jnp.bfloat16), b1=params["b1"].astype(jnp.float32),
        w2=params["w2"].astype(jnp.bfloat16), b2=params["b2"].astype(jnp.float32),
        w3=params["w3"].astype(jnp.bfloat16), b3=params["b3"].astype(jnp.float32),
    )


def mlp_forward(x, prepared, *, tile_b=None):
    """x: (B, in_dim) f32 or bf16. prepared: output of prepare_params (bf16 weights)."""
    B, in_dim = x.shape
    hidden = prepared["w1"].shape[1]
    out_dim = prepared["w3"].shape[1]

    if tile_b is None:
        tile_b = _choose_tile_b(B)
    assert tile_b % 8 == 0, "tile_b must be a multiple of 8"

    # Pad batch (zeros) up to a tile multiple; pad rows are discarded after the call.
    Bp = _round_up(B, tile_b)
    x_in = x if Bp == B else jnp.zeros((Bp, in_dim), x.dtype).at[:B].set(x)
    grid = (Bp // tile_b,)

    consts = (prepared["w1"], prepared["b1"], prepared["w2"], prepared["b2"],
              prepared["w3"], prepared["b3"])

    in_specs = [pl.BlockSpec((tile_b, in_dim), lambda i: (i, 0))]
    in_specs += [pl.BlockSpec(c.shape, lambda i: (0, 0)) for c in consts]
    # Unpadded, narrow output block (last dim == full array dim): 8x less HBM
    # writeback than a 128-wide padded slab at out_dim=16, and no wrapper slice pass.
    out_specs = pl.BlockSpec((tile_b, out_dim), lambda i: (i, 0))

    out = pl.pallas_call(
        mlp_kernel,
        out_shape=jax.ShapeDtypeStruct((Bp, out_dim), jnp.float32),
        grid_spec=pl.GridSpec(grid=grid, in_specs=in_specs, out_specs=out_specs),
        compiler_params=pltpu.CompilerParams(
            dimension_semantics=("parallel",),
            vmem_limit_bytes=_vmem_limit_bytes(
                tile_b, in_dim, hidden, out_dim, jnp.dtype(x.dtype).itemsize),
        ),
    )(x_in, *consts)

    return out if Bp == B else out[:B]


def init_params(key, in_dim, out_dim, hidden=256):
    """Deterministic init mimicking nn.Linear (uniform +/- 1/sqrt(fan_in)), f32.
    Weights stored as (in_features, out_features) = transpose of nn.Linear.weight."""
    ks = jax.random.split(key, 6)

    def linear(kw, kb, fan_in, fan_out):
        bound = 1.0 / jnp.sqrt(fan_in)
        w = jax.random.uniform(kw, (fan_in, fan_out), jnp.float32, -bound, bound)
        b = jax.random.uniform(kb, (1, fan_out), jnp.float32, -bound, bound)
        return w, b

    w1, b1 = linear(ks[0], ks[1], in_dim, hidden)
    w2, b2 = linear(ks[2], ks[3], hidden, hidden)
    w3, b3 = linear(ks[4], ks[5], hidden, out_dim)
    return dict(w1=w1, b1=b1, w2=w2, b2=b2, w3=w3, b3=b3)


def mlp_reference(x, p):
    h1 = jnp.maximum(x @ p["w1"] + p["b1"], 0.0)
    h2 = jnp.maximum(h1 @ p["w2"] + p["b2"], 0.0)
    return h2 @ p["w3"] + p["b3"]


if __name__ == "__main__":
    key = jax.random.PRNGKey(0)
    k_param, k_x = jax.random.split(key)

    B, in_dim, out_dim = 8, 32, 16
    params = init_params(k_param, in_dim, out_dim, hidden=256)
    prepared = prepare_params(params)           # one-time bf16 weight prep
    x = jax.random.normal(k_x, (B, in_dim), jnp.float32)

    fwd = jax.jit(mlp_forward)
    out = jax.block_until_ready(fwd(x, prepared))

    ref = mlp_reference(x, params)               # f32 reference
    assert out.shape == (B, out_dim)
    max_err = float(jnp.max(jnp.abs(out - ref)))
    # bf16 matmul operands (f32 accumulation) => loosened tolerance vs f32 reference.
    assert jnp.allclose(out, ref, atol=5e-2, rtol=5e-2), f"max_err={max_err}"

    print("KERNEL_OK")
</pallas_src>

<mosaic_0001>
module attributes {stable_mosaic.version = 11 : i64} {
  func.func @mlp_kernel(%arg0: i32, %arg1: memref<8x32xf32, #tpu.memory_space<vmem>>, %arg2: memref<32x256xbf16, #tpu.memory_space<vmem>>, %arg3: memref<1x256xf32, #tpu.memory_space<vmem>>, %arg4: memref<256x256xbf16, #tpu.memory_space<vmem>>, %arg5: memref<1x256xf32, #tpu.memory_space<vmem>>, %arg6: memref<256x16xbf16, #tpu.memory_space<vmem>>, %arg7: memref<1x16xf32, #tpu.memory_space<vmem>>, %arg8: memref<8x16xf32, #tpu.memory_space<vmem>>) attributes {dimension_semantics = [#tpu.dimension_semantics<parallel>], iteration_bounds = array<i64: 1>, scalar_prefetch = 0 : i64, scratch_operands = 0 : i64, tpu.core_type = #tpu.core_type<tc>, window_params = [{transform_indices = @transform_0, window_bounds = array<i64: 8, 32>}, {pipeline_mode = #tpu.pipeline_mode<synchronous>, transform_indices = @transform_1, window_bounds = array<i64: 32, 256>}, {pipeline_mode = #tpu.pipeline_mode<synchronous>, transform_indices = @transform_2, window_bounds = array<i64: 1, 256>}, {pipeline_mode = #tpu.pipeline_mode<synchronous>, transform_indices = @transform_3, window_bounds = array<i64: 256, 256>}, {pipeline_mode = #tpu.pipeline_mode<synchronous>, transform_indices = @transform_4, window_bounds = array<i64: 1, 256>}, {pipeline_mode = #tpu.pipeline_mode<synchronous>, transform_indices = @transform_5, window_bounds = array<i64: 256, 16>}, {pipeline_mode = #tpu.pipeline_mode<synchronous>, transform_indices = @transform_6, window_bounds = array<i64: 1, 16>}, {transform_indices = @transform_7, window_bounds = array<i64: 8, 16>}]} {
    %c0 = arith.constant 0 : index
    %c0_0 = arith.constant 0 : index
    %0 = vector.load %arg1[%c0, %c0_0] : memref<8x32xf32, #tpu.memory_space<vmem>>, vector<8x32xf32>
    %1 = arith.truncf %0 : vector<8x32xf32> to vector<8x32xbf16>
    %c0_1 = arith.constant 0 : index
    %c0_2 = arith.constant 0 : index
    %2 = vector.load %arg2[%c0_1, %c0_2] : memref<32x256xbf16, #tpu.memory_space<vmem>>, vector<32x256xbf16>
    %cst = arith.constant dense<0.000000e+00> : vector<8x256xf32>
    %3 = tpu.matmul %1, %2, %cst {dimension_numbers = #tpu.dot_dimension_numbers<[1], [0], [0], [1], [0, 0, 1, 1], [], []>} : vector<8x32xbf16>, vector<32x256xbf16>, vector<8x256xf32> -> vector<8x256xf32>
    %c0_3 = arith.constant 0 : index
    %c0_4 = arith.constant 0 : index
    %4 = vector.load %arg3[%c0_3, %c0_4] : memref<1x256xf32, #tpu.memory_space<vmem>>, vector<1x256xf32>
    %5 = vector.broadcast %4 : vector<1x256xf32> to vector<8x256xf32>
    %6 = arith.addf %3, %5 : vector<8x256xf32>
    %cst_5 = arith.constant 0.000000e+00 : f32
    %7 = vector.broadcast %cst_5 : f32 to vector<8x256xf32>
    %8 = arith.maximumf %6, %7 : vector<8x256xf32>
    %9 = arith.truncf %8 : vector<8x256xf32> to vector<8x256xbf16>
    %c0_6 = arith.constant 0 : index
    %c0_7 = arith.constant 0 : index
    %10 = vector.load %arg4[%c0_6, %c0_7] : memref<256x256xbf16, #tpu.memory_space<vmem>>, vector<256x256xbf16>
    %cst_8 = arith.constant dense<0.000000e+00> : vector<8x256xf32>
    %11 = tpu.matmul %9, %10, %cst_8 {dimension_numbers = #tpu.dot_dimension_numbers<[1], [0], [0], [1], [0, 0, 1, 1], [], []>} : vector<8x256xbf16>, vector<256x256xbf16>, vector<8x256xf32> -> vector<8x256xf32>
    %c0_9 = arith.constant 0 : index
    %c0_10 = arith.constant 0 : index
    %12 = vector.load %arg5[%c0_9, %c0_10] : memref<1x256xf32, #tpu.memory_space<vmem>>, vector<1x256xf32>
    %13 = vector.broadcast %12 : vector<1x256xf32> to vector<8x256xf32>
    %14 = arith.addf %11, %13 : vector<8x256xf32>
    %cst_11 = arith.constant 0.000000e+00 : f32
    %15 = vector.broadcast %cst_11 : f32 to vector<8x256xf32>
    %16 = arith.maximumf %14, %15 : vector<8x256xf32>
    %17 = arith.truncf %16 : vector<8x256xf32> to vector<8x256xbf16>
    %c0_12 = arith.constant 0 : index
    %c0_13 = arith.constant 0 : index
    %18 = vector.load %arg6[%c0_12, %c0_13] : memref<256x16xbf16, #tpu.memory_space<vmem>>, vector<256x16xbf16>
    %cst_14 = arith.constant dense<0.000000e+00> : vector<8x16xf32>
    %19 = tpu.matmul %17, %18, %cst_14 {dimension_numbers = #tpu.dot_dimension_numbers<[1], [0], [0], [1], [0, 0, 1, 1], [], []>} : vector<8x256xbf16>, vector<256x16xbf16>, vector<8x16xf32> -> vector<8x16xf32>
    %c0_15 = arith.constant 0 : index
    %c0_16 = arith.constant 0 : index
    %20 = vector.load %arg7[%c0_15, %c0_16] : memref<1x16xf32, #tpu.memory_space<vmem>>, vector<1x16xf32>
    %21 = vector.broadcast %20 : vector<1x16xf32> to vector<8x16xf32>
    %22 = arith.addf %19, %21 : vector<8x16xf32>
    %c0_17 = arith.constant 0 : index
    %c0_18 = arith.constant 0 : index
    %23 = vector.load %arg8[%c0_17, %c0_18] : memref<8x16xf32, #tpu.memory_space<vmem>>, vector<8x16xf32>
    tpu.vector_store %arg8[%c0_17, %c0_18], %22 {strides = array<i32>} : memref<8x16xf32, #tpu.memory_space<vmem>>, vector<8x16xf32>,
    return
  }
  func.func @transform_0(%arg0: i32) -> (i32, i32) {
    %c0_i32 = arith.constant 0 : i32
    %c0_i32_0 = arith.constant 0 : i32
    return %arg0, %c0_i32 : i32, i32
  }
  func.func @transform_1(%arg0: i32) -> (i32, i32) {
    %c0_i32 = arith.constant 0 : i32
    %c0_i32_0 = arith.constant 0 : i32
    %c0_i32_1 = arith.constant 0 : i32
    return %c0_i32, %c0_i32_0 : i32, i32
  }
  func.func @transform_2(%arg0: i32) -> (i32, i32) {
    %c0_i32 = arith.constant 0 : i32
    %c0_i32_0 = arith.constant 0 : i32
    %c0_i32_1 = arith.constant 0 : i32
    return %c0_i32, %c0_i32_0 : i32, i32
  }
  func.func @transform_3(%arg0: i32) -> (i32, i32) {
    %c0_i32 = arith.constant 0 : i32
    %c0_i32_0 = arith.constant 0 : i32
    %c0_i32_1 = arith.constant 0 : i32
    return %c0_i32, %c0_i32_0 : i32, i32
  }
  func.func @transform_4(%arg0: i32) -> (i32, i32) {
    %c0_i32 = arith.constant 0 : i32
    %c0_i32_0 = arith.constant 0 : i32
    %c0_i32_1 = arith.constant 0 : i32
    return %c0_i32, %c0_i32_0 : i32, i32
  }
  func.func @transform_5(%arg0: i32) -> (i32, i32) {
    %c0_i32 = arith.constant 0 : i32
    %c0_i32_0 = arith.constant 0 : i32
    %c0_i32_1 = arith.constant 0 : i32
    return %c0_i32, %c0_i32_0 : i32, i32
  }
  func.func @transform_6(%arg0: i32) -> (i32, i32) {
    %c0_i32 = arith.constant 0 : i32
    %c0_i32_0 = arith.constant 0 : i32
    %c0_i32_1 = arith.constant 0 : i32
    return %c0_i32, %c0_i32_0 : i32, i32
  }
  func.func @transform_7(%arg0: i32) -> (i32, i32) {
    %c0_i32 = arith.constant 0 : i32
    %c0_i32_0 = arith.constant 0 : i32
    return %arg0, %c0_i32 : i32, i32
  }
}

</mosaic_0001>

<bundles_post_ra>
// kernel: mlp_forward.1
= control target key start
LH: loop header
LB: loop body
LE: loop exit
PB: predicated region body
PF: predicated region fallthrough
CT: control target
= control target key end

     0   :  { %12 = vsyncpa [#allocation3], 0  ;;  %s996_s0 = inlined_call_operand.vmem [shape: f32[8,32], index: 0, kind: input, shape index: {}]   ;;  %s997_s1 = inlined_call_operand.vmem [shape: bf16[32,256], index: 1, kind: input, shape index: {}]   ;;  %s998_s2 = inlined_call_operand.vmem [shape: f32[1,256], index: 2, kind: input, shape index: {}]   ;;  %s999_s3 = inlined_call_operand.hbm [shape: bf16[256,256], index: 3, kind: input, shape index: {}]   ;;  %s1000_s4 = inlined_call_operand.vmem [shape: f32[1,256], index: 4, kind: input, shape index: {}]   ;;  %s1001_s5 = inlined_call_operand.vmem [shape: bf16[256,16], index: 5, kind: input, shape index: {}]   ;;  %s1002_s6 = inlined_call_operand.vmem [shape: f32[1,16], index: 6, kind: input, shape index: {}]   ;;  %s1003_s7 = inlined_call_operand.hbm [shape: f32[8,16], index: 7, kind: output, shape index: {}]  }
   0x1   :  { %13 = vsyncpa [#allocation4], 0  ;;  %s24_s26 = sshll.u32 %s999_s3, 4  ;;  %s860_s27 = smov [#allocation2]   ;;  %s25_s26 = int_to_ptr.hbm [resolvable:$true] %s24_s26 }
   0x2   :  { %s26_s28 = sshll.u32 %s860_s27, 4  ;;  %s861_s29 = smov 128   ;;  %s27_s28 = int_to_ptr.vmem [resolvable:$true] %s26_s28 }
   0x3   :  { %s862_s30 = smov 8  }
   0x4   :  { %32 = dma.hbm_to_vmem [thread:$0]  %s25_s26, 4096, %s27_s28, [#allocation3], %s861_s29, %s861_s29, %s862_s30  }
   0x5   :  { %856 = dma.done.wait [#allocation3], 4096  }
   0x6   :  { %857 = vsyncadd [#allocation3], 4294963200  ;;  %v551_v0 = vld [vmem:[%s997_s1 + $0x10] sm:$0xf]  ;;  %v754_v1 = vld [vmem:[%s997_s1 + $0x14] sm:$0xf0] }
   0x7   :  { %v753_v2 = vld [vmem:[%s997_s1 + $0x14] sm:$0xf]  ;;  %v552_v3 = vor.u32 %v754_v1, %v551_v0  ;;  %v553_v4 = vld [vmem:[%s997_s1 + $0x18] sm:$0xf0]  ;;  %v543_v5 = vld [vmem:[%s997_s1] sm:$0xf] }
   0x8   :  { %v752_v6 = vld [vmem:[%s997_s1 + $0x4] sm:$0xf0]  ;;  %v556_v7 = vor.u32 %v753_v2, %v553_v4  ;;  %v751_v8 = vld [vmem:[%s997_s1 + $0x4] sm:$0xf]  ;;  %v545_v9 = vld [vmem:[%s997_s1 + $0x8] sm:$0xf0] }
   0x9   :  { %v44_v10 = vld [vmem:[%s996_s0] sm:$0xff]  ;;  %vm76_vm0 = vcmask 261120   ;;  %86 = vmatpush.bf16.msra.mxu0 %v552_v3  ;;  %v544_v11 = vor.u32 %v752_v6, %v543_v5  ;;  %v617_v12 = vld [vmem:[#allocation2 + $0x70] sm:$0xf]  ;;  %v770_v13 = vld [vmem:[#allocation2 + $0x74] sm:$0xf0]  ;;  %v548_v15 = vor.u32 %v751_v8, %v545_v9 }
   0xa   :  { %v681_v14 = vld [vmem:[#allocation2 + $0xf0] sm:$0xf]  ;;  %99 = vmatpush.bf16.msra.mxu1 %v556_v7  ;;  %v618_v16 = vor.u32 %v770_v13, %v617_v12  ;;  %v786_v17 = vld [vmem:[#allocation2 + $0xf4] sm:$0xf0]  ;;  %v769_v18 = vld [vmem:[#allocation2 + $0x74] sm:$0xf]  ;;  %v45_v25 = vpack.c.bf16 %v44_v10, %v44_v10 }
   0xb   :  { %v619_v19 = vld [vmem:[#allocation2 + $0x78] sm:$0xf0]  ;;  %v682_v20 = vor.u32 %v786_v17, %v681_v14  ;;  %v785_v22 = vld [vmem:[#allocation2 + $0xf4] sm:$0xf]  ;;  %v609_v24 = vld [vmem:[#allocation2 + $0x60] sm:$0xf] }
   0xc   :  { %v622_v21 = vor.u32 %v769_v18, %v619_v19  ;;  %v683_v23 = vld [vmem:[#allocation2 + $0xf8] sm:$0xf0]  ;;  %308 = vmatpush.bf16.msra.mxu2 %v618_v16  ;;  %v768_v27 = vld [vmem:[#allocation2 + $0x64] sm:$0xf0]  ;;  %v673_v28 = vld [vmem:[#allocation2 + $0xe0] sm:$0xf] }
   0xd   :  { %v686_v26 = vor.u32 %v785_v22, %v683_v23  ;;  %v784_v29 = vld [vmem:[#allocation2 + $0xe4] sm:$0xf0]  ;;  %87 = vmatpush.bf16.msra.mxu0 %v544_v11  ;;  %321 = vmatpush.bf16.msra.mxu3 %v682_v20  ;;  %v610_v30 = vor.u32 %v768_v27, %v609_v24  ;;  %v767_v32 = vld [vmem:[#allocation2 + $0x64] sm:$0xf]  ;;  %v611_v33 = vld [vmem:[#allocation2 + $0x68] sm:$0xf0] }
   0xe   :  { %v674_v31 = vor.u32 %v784_v29, %v673_v28  ;;  %v783_v34 = vld [vmem:[#allocation2 + $0xe4] sm:$0xf]  ;;  %100 = vmatpush.bf16.msra.mxu1 %v548_v15  ;;  %v614_v35 = vor.u32 %v767_v32, %v611_v33  ;;  %v675_v36 = vld [vmem:[#allocation2 + $0xe8] sm:$0xf0]  ;;  %v601_v37 = vld [vmem:[#allocation2 + $0x50] sm:$0xf] }
   0xf   :  { %v766_v38 = vld [vmem:[#allocation2 + $0x54] sm:$0xf0]  ;;  %v678_v39 = vor.u32 %v783_v34, %v675_v36  ;;  %v665_v40 = vld [vmem:[#allocation2 + $0xd0] sm:$0xf]  ;;  %v765_v42 = vld [vmem:[#allocation2 + $0x54] sm:$0xf] }
  0x10   :  { %v782_v41 = vld [vmem:[#allocation2 + $0xd4] sm:$0xf0]  ;;  %557 = vmatmul.msk.bf16.vlgmr.msra.gmra.mxu0 %vm76_vm0, %v45_v25  ;;  %309 = vmatpush.bf16.msra.mxu2 %v610_v30  ;;  %v602_v43 = vor.u32 %v766_v38, %v601_v37  ;;  %v603_v44 = vld [vmem:[#allocation2 + $0x58] sm:$0xf0]  ;;  %v781_v45 = vld [vmem:[#allocation2 + $0xd4] sm:$0xf] }
  0x11   :  { %334 = vmatpush.bf16.msrb.mxu0 %v622_v21  ;;  %v667_v46 = vld [vmem:[#allocation2 + $0xd8] sm:$0xf0]  ;;  %558 = vmatmul.msk.bf16.vlgmr.msra.gmra.mxu1 %vm76_vm0, %v45_v25  ;;  %v666_v47 = vor.u32 %v782_v41, %v665_v40  ;;  %v593_v48 = vld [vmem:[#allocation2 + $0x40] sm:$0xf]  ;;  %v764_v49 = vld [vmem:[#allocation2 + $0x44] sm:$0xf0]  ;;  %v606_v50 = vor.u32 %v765_v42, %v603_v44 }
  0x12   :  { %347 = vmatpush.bf16.msrb.mxu1 %v686_v26  ;;  %322 = vmatpush.bf16.msra.mxu3 %v674_v31  ;;  %v657_v51 = vld [vmem:[#allocation2 + $0xc0] sm:$0xf]  ;;  %v780_v52 = vld [vmem:[#allocation2 + $0xc4] sm:$0xf0]  ;;  %v670_v53 = vor.u32 %v781_v45, %v667_v46  ;;  %v763_v54 = vld [vmem:[#allocation2 + $0x44] sm:$0xf]  ;;  %v594_v56 = vor.u32 %v764_v49, %v593_v48 }
  0x13   :  { %v595_v55 = vld [vmem:[#allocation2 + $0x48] sm:$0xf0]  ;;  %v779_v57 = vld [vmem:[#allocation2 + $0xc4] sm:$0xf]  ;;  %v658_v59 = vor.u32 %v780_v52, %v657_v51  ;;  %v585_v60 = vld [vmem:[#allocation2 + $0x30] sm:$0xf] }
  0x14   :  { %310 = vmatpush.bf16.msra.mxu2 %v602_v43  ;;  %v659_v58 = vld [vmem:[#allocation2 + $0xc8] sm:$0xf0]  ;;  %v762_v61 = vld [vmem:[#allocation2 + $0x34] sm:$0xf0]  ;;  %v598_v62 = vor.u32 %v763_v54, %v595_v55  ;;  %v649_v63 = vld [vmem:[#allocation2 + $0xb0] sm:$0xf] }
  0x15   :  { %335 = vmatpush.bf16.msrb.mxu0 %v614_v35  ;;  %v778_v0 = vld [vmem:[#allocation2 + $0xb4] sm:$0xf0]  ;;  %v662_v1 = vor.u32 %v779_v57, %v659_v58  ;;  %v761_v2 = vld [vmem:[#allocation2 + $0x34] sm:$0xf]  ;;  %v587_v3 = vld [vmem:[#allocation2 + $0x38] sm:$0xf0]  ;;  %v586_v4 = vor.u32 %v762_v61, %v585_v60 }
  0x16   :  { %348 = vmatpush.bf16.msrb.mxu1 %v678_v39  ;;  %323 = vmatpush.bf16.msra.mxu3 %v666_v47  ;;  %v777_v5 = vld [vmem:[#allocation2 + $0xb4] sm:$0xf]  ;;  %v651_v6 = vld [vmem:[#allocation2 + $0xb8] sm:$0xf0]  ;;  %v650_v7 = vor.u32 %v778_v0, %v649_v63  ;;  %v577_v8 = vld [vmem:[#allocation2 + $0x20] sm:$0xf]  ;;  %v590_v10 = vor.u32 %v761_v2, %v587_v3 }
  0x17   :  { %v760_v9 = vld [vmem:[#allocation2 + $0x24] sm:$0xf0]  ;;  %v641_v11 = vld [vmem:[#allocation2 + $0xa0] sm:$0xf]  ;;  %v654_v13 = vor.u32 %v777_v5, %v651_v6  ;;  %v759_v14 = vld [vmem:[#allocation2 + $0x24] sm:$0xf] }
  0x18   :  { %311 = vmatpush.bf16.msra.mxu2 %v594_v56  ;;  %v776_v12 = vld [vmem:[#allocation2 + $0xa4] sm:$0xf0]  ;;  %v579_v15 = vld [vmem:[#allocation2 + $0x28] sm:$0xf0]  ;;  %v578_v16 = vor.u32 %v760_v9, %v577_v8  ;;  %v775_v17 = vld [vmem:[#allocation2 + $0xa4] sm:$0xf] }
  0x19   :  { %336 = vmatpush.bf16.msrb.mxu0 %v606_v50  ;;  %v643_v18 = vld [vmem:[#allocation2 + $0xa8] sm:$0xf0]  ;;  %v642_v19 = vor.u32 %v776_v12, %v641_v11  ;;  %v582_v20 = vor.u32 %v759_v14, %v579_v15  ;;  %v569_v22 = vld [vmem:[#allocation2 + $0x10] sm:$0xf]  ;;  %v758_v23 = vld [vmem:[#allocation2 + $0x14] sm:$0xf0] }
  0x1a   :  { %349 = vmatpush.bf16.msrb.mxu1 %v670_v53  ;;  %324 = vmatpush.bf16.msra.mxu3 %v658_v59  ;;  %v646_v21 = vor.u32 %v775_v17, %v643_v18  ;;  %v633_v24 = vld [vmem:[#allocation2 + $0x90] sm:$0xf]  ;;  %v570_v25 = vor.u32 %v758_v23, %v569_v22  ;;  %v774_v26 = vld [vmem:[#allocation2 + $0x94] sm:$0xf0]  ;;  %v757_v27 = vld [vmem:[#allocation2 + $0x14] sm:$0xf] }
  0x1b   :  { %v571_v28 = vld [vmem:[#allocation2 + $0x18] sm:$0xf0]  ;;  %v634_v29 = vor.u32 %v774_v26, %v633_v24  ;;  %v773_v31 = vld [vmem:[#allocation2 + $0x94] sm:$0xf]  ;;  %v561_v34 = vld [vmem:[#allocation2] sm:$0xf] }
  0x1c   :  { %312 = vmatpush.bf16.msra.mxu2 %v586_v4  ;;  %v574_v30 = vor.u32 %v757_v27, %v571_v28  ;;  %v635_v32 = vld [vmem:[#allocation2 + $0x98] sm:$0xf0]  ;;  %v756_v35 = vld [vmem:[#allocation2 + $0x4] sm:$0xf0]  ;;  %v625_v36 = vld [vmem:[#allocation2 + $0x80] sm:$0xf] }
  0x1d   :  { %337 = vmatpush.bf16.msrb.mxu0 %v598_v62  ;;  %v638_v33 = vor.u32 %v773_v31, %v635_v32  ;;  %v562_v37 = vor.u32 %v756_v35, %v561_v34  ;;  %v772_v38 = vld [vmem:[#allocation2 + $0x84] sm:$0xf0]  ;;  %v755_v39 = vld [vmem:[#allocation2 + $0x4] sm:$0xf]  ;;  %v563_v40 = vld [vmem:[#allocation2 + $0x8] sm:$0xf0] }
  0x1e   :  { %350 = vmatpush.bf16.msrb.mxu1 %v662_v1  ;;  %325 = vmatpush.bf16.msra.mxu3 %v650_v7  ;;  %v626_v41 = vor.u32 %v772_v38, %v625_v36  ;;  %v566_v42 = vor.u32 %v755_v39, %v563_v40  ;;  %v771_v43 = vld [vmem:[#allocation2 + $0x84] sm:$0xf]  ;;  %v627_v44 = vld [vmem:[#allocation2 + $0x88] sm:$0xf0]  ;;  %v802_v46 = vld [vmem:[%s1001_s5 + $0x78] sm:$0xff]  ;;  %s863_s9 = smov [#allocation5]  }
  0x1f   :  { %v630_v45 = vor.u32 %v771_v43, %v627_v44  ;;  %v794_v47 = vld [vmem:[%s1001_s5 + $0x38] sm:$0xff]  ;;  %v801_v48 = vld [vmem:[%s1001_s5 + $0x70] sm:$0xff]  ;;  %v800_v50 = vld [vmem:[%s1001_s5 + $0x68] sm:$0xff]  ;;  %s529_s10 = sshll.u32 %s863_s9, 4  ;;  %s531_s13 = sshll.u32 %s1003_s7, 4  ;;  %vm522_vm1 = vcmask 130048   ;;  %s530_s10 = int_to_ptr.vmem [resolvable:$true] %s529_s10  ;;  %s532_s13 = int_to_ptr.hbm [resolvable:$true] %s531_s13 }
  0x20   :  { %313 = vmatpush.bf16.msra.mxu2 %v578_v16  ;;  %v793_v49 = vld [vmem:[%s1001_s5 + $0x30] sm:$0xff]  ;;  %v792_v51 = vld [vmem:[%s1001_s5 + $0x28] sm:$0xff]  ;;  %v799_v52 = vld [vmem:[%s1001_s5 + $0x60] sm:$0xff] }
  0x21   :  { %338 = vmatpush.bf16.msrb.mxu0 %v590_v10  ;;  %v791_v53 = vld [vmem:[%s1001_s5 + $0x20] sm:$0xff]  ;;  %v798_v54 = vld [vmem:[%s1001_s5 + $0x58] sm:$0xff]  ;;  %v797_v56 = vld [vmem:[%s1001_s5 + $0x50] sm:$0xff] }
  0x22   :  { %351 = vmatpush.bf16.msrb.mxu1 %v654_v13  ;;  %326 = vmatpush.bf16.msra.mxu3 %v642_v19  ;;  %v50_v55 = vld [vmem:[%s998_s2] sm:$0x3]  ;;  %v790_v5 = vld [vmem:[%s1001_s5 + $0x18] sm:$0xff]  ;;  %v796_v6 = vld [vmem:[%s1001_s5 + $0x48] sm:$0xff] }
  0x23   :  { %v52_v57 = vperm.slane %v50_v55, 0  ;;  %v53_v58 = vperm.slane %v50_v55, 1  ;;  %v789_v7 = vld [vmem:[%s1001_s5 + $0x10] sm:$0xff]  ;;  %v795_v8 = vld [vmem:[%s1001_s5 + $0x40] sm:$0xff]  ;;  %v788_v9 = vld [vmem:[%s1001_s5 + $0x8] sm:$0xff] }
  0x24   :  { %314 = vmatpush.bf16.msra.mxu2 %v570_v25  ;;  %v787_v10 = vld [vmem:[%s1001_s5] sm:$0xff] }
  0x25   :  { %339 = vmatpush.bf16.msrb.mxu0 %v582_v20  ;;  %v142_v11 = vld [vmem:[%s1000_s4] sm:$0x3] }
  0x26   :  { %352 = vmatpush.bf16.msrb.mxu1 %v646_v21  ;;  %327 = vmatpush.bf16.msra.mxu3 %v634_v29  ;;  %v145_v12 = vperm.slane %v142_v11, 1  ;;  %v144_v17 = vperm.slane %v142_v11, 0  ;;  %v807_v31 = vld [vmem:[%s1002_s6] ss:$0 sm:$0xff] }
  0x28   :  { %315 = vmatpush.bf16.msra.mxu2 %v562_v37 }
  0x29   :  { %340 = vmatpush.bf16.msrb.mxu0 %v574_v30 }
  0x2a   :  { %353 = vmatpush.bf16.msrb.mxu1 %v638_v33  ;;  %328 = vmatpush.bf16.msra.mxu3 %v626_v41 }
  0x2c   :  { %496 = vmatpush.bf16.msrb.mxu2 %v794_v47 }
  0x2d   :  { %341 = vmatpush.bf16.msrb.mxu0 %v566_v42 }
  0x2e   :  { %354 = vmatpush.bf16.msrb.mxu1 %v630_v45  ;;  %509 = vmatpush.bf16.msrb.mxu3 %v802_v46 }
  0x30   :  { %497 = vmatpush.bf16.msrb.mxu2 %v793_v49 }
  0x32   :  { %510 = vmatpush.bf16.msrb.mxu3 %v801_v48 }
  0x34   :  { %498 = vmatpush.bf16.msrb.mxu2 %v792_v51 }
  0x36   :  { %511 = vmatpush.bf16.msrb.mxu3 %v800_v50 }
  0x38   :  { %499 = vmatpush.bf16.msrb.mxu2 %v791_v53 }
  0x3a   :  { %512 = vmatpush.bf16.msrb.mxu3 %v799_v52 }
  0x3c   :  { %500 = vmatpush.bf16.msrb.mxu2 %v790_v5 }
  0x3e   :  { %513 = vmatpush.bf16.msrb.mxu3 %v798_v54 }
  0x40   :  { %501 = vmatpush.bf16.msrb.mxu2 %v789_v7 }
  0x42   :  { %514 = vmatpush.bf16.msrb.mxu3 %v797_v56 }
  0x44   :  { %502 = vmatpush.bf16.msrb.mxu2 %v788_v9 }
  0x46   :  { %515 = vmatpush.bf16.msrb.mxu3 %v796_v6 }
  0x48   :  { %503 = vmatpush.bf16.msrb.mxu2 %v787_v10 }
  0x4a   :  { %516 = vmatpush.bf16.msrb.mxu3 %v795_v8 }
  0x8d   :  { %v89_v59 = vpop.f32.mrf.mxu0 }
  0x8e   :  { %v90_v60 = vadd.f32 %v89_v59, %v52_v57  ;;  %v102_v61 = vpop.f32.mrf.mxu1 }
  0x8f   :  { %v103_v62 = vadd.f32 %v102_v61, %v53_v58 }
  0x90   :  { %v106_v63 = vmax.f32 %v90_v60, 0.0 }
  0x91   :  { %v107_v0 = vmax.f32 %v103_v62, 0.0 }
  0x92   :  { %v108_v1 = vpack.c.bf16 %v106_v63, %v106_v63 }
  0x93   :  { %v109_v2 = vpack.c.bf16 %v107_v0, %v107_v0 }
  0x94   :  { %316 = vmatmul.bf16.vlgmr.msra.gmra.mxu2 %v108_v1  ;;  %342 = vmatmul.bf16.vlgmr.msrb.gmra.mxu0 %v108_v1 }
  0x95   :  { %329 = vmatmul.bf16.vlgmr.msra.gmra.mxu3 %v109_v2  ;;  %355 = vmatmul.bf16.vlgmr.msrb.gmra.mxu1 %v109_v2  ;;  %v91_v3 = vpop.f32.mrf.mxu0 }
  0x96   :  { %v104_v4 = vpop.f32.mrf.mxu1 }
 0x111   :  { %v343_v13 = vpop.f32.mrf.mxu0 }
 0x112   :  { %v344_v14 = vadd.f32 %v343_v13, %v145_v12  ;;  %v356_v15 = vpop.f32.mrf.mxu1 }
 0x114   :  { %v357_v16 = vadd.f32 %v356_v15, %v344_v14 }
 0x116   :  { %v361_v18 = vmax.f32 %v357_v16, 0.0 }
 0x117   :  { %v317_v19 = vpop.f32.mrf.mxu2 }
 0x118   :  { %v363_v20 = vpack.c.bf16 %v361_v18, %v361_v18  ;;  %v318_v21 = vadd.f32 %v317_v19, %v144_v17  ;;  %v330_v22 = vpop.f32.mrf.mxu3 }
 0x119   :  { %v345_v23 = vpop.f32.mrf.mxu0 }
 0x11a   :  { %v331_v24 = vadd.f32 %v330_v22, %v318_v21  ;;  %v358_v25 = vpop.f32.mrf.mxu1  ;;  %517 = vmatmul.bf16.vlgmr.msrb.gmra.mxu3 %v363_v20 }
 0x11c   :  { %v360_v26 = vmax.f32 %v331_v24, 0.0 }
 0x11e   :  { %v362_v27 = vpack.c.bf16 %v360_v26, %v360_v26 }
 0x11f   :  { %v319_v28 = vpop.f32.mrf.mxu2 }
 0x120   :  { %v332_v29 = vpop.f32.mrf.mxu3  ;;  %504 = vmatmul.bf16.vlgmr.msrb.gmra.mxu2 %v362_v27 }
 0x19d   :  { %v518_v30 = vpop.f32.mrf.mxu3 }
 0x1a3   :  { %v505_v32 = vpop.f32.mrf.mxu2 }
 0x1a4   :  { %v506_v33 = vadd.f32 %v807_v31, %v505_v32 }
 0x1a5   :  { %v520_v34 = vpop.f32.mrf.mxu3 }
 0x1a6   :  { %v519_v35 = vadd.f32 %v518_v30, %v506_v33 }
 0x1a8   :  { %523 = vst.msk [vmem:[#allocation5] sm:$0xff] %vm522_vm1, %v519_v35 }
 0x1a9   :  { %534 = dma.vmem_to_hbm [thread:$0]  %s530_s10, 128, %s532_s13, [#allocation4]  }
 0x1ab   :  { %v507_v36 = vpop.f32.mrf.mxu2 }
 0x1ac   :  { %858 = dma.done.wait [#allocation4], 128  }
 0x1ad   :  { %859 = vsyncadd [#allocation4], 4294967168 }
 0x1ae   :  { %539 = vsyncpa [#allocation3], 1 }
 0x1af   :  { %540 = vsyncpa [#allocation4], 1 }

</bundles_post_ra>
